<compile_context>
chip_gen: v7x
topology: tpu7x:2x2x1
jax: 0.10.0
libtpu: 0.0.40
codegen_flags: <defaults>
</compile_context>

<pallas_src>
import functools

import jax
import jax.numpy as jnp
from jax import lax
from jax.experimental import pallas as pl
from jax.experimental.pallas import tpu as pltpu

_LANE = 128
_SUBLANE = 8


def mlp_kernel(x_ref, w1_ref, b1_ref, w2_ref, b2_ref, b3_ref, o_ref):
    x = x_ref[...]       # [tB, In_p]   compute dtype (bf16)
    w1 = w1_ref[...]     # [H_p, In_p]  compute dtype
    w2 = w2_ref[...]     # [H_p, H_p]   compute dtype
    cd = x.dtype

    # fc1: x @ W1^T  -> contract x dim 1 with w1 dim 1 (no transpose).
    h1 = lax.dot_general(x, w1, (((1,), (1,)), ((), ())),
                         preferred_element_type=jnp.float32) + b1_ref[...]
    # fc2: h1 @ W2^T -> contract last dims.
    h2 = lax.dot_general(h1.astype(cd), w2, (((1,), (1,)), ((), ())),
                         preferred_element_type=jnp.float32) + b2_ref[...]
    # fc3 (weight tied to W1^T): h2 @ W1 -> contract h2 dim 1 with w1 dim 0.
    out = lax.dot_general(h2.astype(cd), w1, (((1,), (0,)), ((), ())),
                          preferred_element_type=jnp.float32) + b3_ref[...]

    o_ref[...] = out.astype(o_ref.dtype)


def _round_up(n, m):
    return ((n + m - 1) // m) * m


def _pad2(a, rows, cols):
    return jnp.pad(a, ((0, rows - a.shape[0]), (0, cols - a.shape[1])))


def _vmem_limit_bytes(tile_b, in_p, h_p, compute_itemsize, acc_itemsize=4):
    # Pipeline double-buffers every block (including grid-invariant ones).
    x_bytes = 2 * tile_b * in_p * compute_itemsize
    out_bytes = 2 * tile_b * in_p * acc_itemsize
    w_bytes = 2 * (h_p * in_p + h_p * h_p) * compute_itemsize
    b_bytes = 2 * (2 * h_p + in_p) * acc_itemsize
    total = (x_bytes + out_bytes + w_bytes + b_bytes) * 2  # 2x headroom
    return int(min(max(total, 4 << 20), 32 << 20))


def neural_network_forward(x, w1, b1, w2, b2, b3, *, tile_b=128, use_bf16=True):
    """x: [B, In], w1: [H, In], w2: [H, H], b1/b2: [H], b3: [In] (out_size == In)."""
    B, In = x.shape
    H = w1.shape[0]
    assert w1.shape == (H, In)
    assert w2.shape == (H, H)
    assert b1.shape == (H,) and b2.shape == (H,) and b3.shape == (In,)

    compute_dtype = jnp.bfloat16 if use_bf16 else jnp.float32
    c_itemsize = jnp.dtype(compute_dtype).itemsize

    # Lane-dense padded feature dims; batch padded to a multiple of the tile.
    in_p = _round_up(In, _LANE)
    h_p = _round_up(H, _LANE)
    tile_b = max(_SUBLANE, min(_round_up(tile_b, _SUBLANE), _round_up(B, _SUBLANE)))
    b_p = _round_up(B, tile_b)

    # Cast once in the wrapper (grid-invariant weights + streamed input);
    # biases stay f32 so they are added into the f32 accumulators exactly.
    x_p = _pad2(x, b_p, in_p).astype(compute_dtype)
    w1_p = _pad2(w1, h_p, in_p).astype(compute_dtype)
    w2_p = _pad2(w2, h_p, h_p).astype(compute_dtype)
    b1_p = _pad2(b1.reshape(1, H).astype(jnp.float32), 1, h_p)
    b2_p = _pad2(b2.reshape(1, H).astype(jnp.float32), 1, h_p)
    b3_p = _pad2(b3.reshape(1, In).astype(jnp.float32), 1, in_p)

    grid = (b_p // tile_b,)
    resident = lambda shape: pl.BlockSpec(shape, lambda i: (0,) * len(shape))

    out_p = pl.pallas_call(
        mlp_kernel,
        out_shape=jax.ShapeDtypeStruct((b_p, in_p), jnp.float32),
        grid=grid,
        in_specs=[
            pl.BlockSpec((tile_b, in_p), lambda i: (i, 0)),  # x: tiled over batch
            resident((h_p, in_p)),                           # w1 (shared fc1 / fc3)
            resident((1, h_p)),                              # b1
            resident((h_p, h_p)),                            # w2
            resident((1, h_p)),                              # b2
            resident((1, in_p)),                             # b3
        ],
        out_specs=pl.BlockSpec((tile_b, in_p), lambda i: (i, 0)),
        compiler_params=pltpu.CompilerParams(
            dimension_semantics=("parallel",),
            vmem_limit_bytes=_vmem_limit_bytes(tile_b, in_p, h_p, c_itemsize),
        ),
    )(x_p, w1_p, b1_p, w2_p, b2_p, b3_p)

    return out_p[:B, :In]


def reference_forward(x, w1, b1, w2, b2, b3, *, use_bf16=False):
    cd = jnp.bfloat16 if use_bf16 else jnp.float32
    xc, w1c, w2c = x.astype(cd), w1.astype(cd), w2.astype(cd)
    h1 = lax.dot_general(xc, w1c, (((1,), (1,)), ((), ())),
                         preferred_element_type=jnp.float32) + b1
    h2 = lax.dot_general(h1.astype(cd), w2c, (((1,), (1,)), ((), ())),
                         preferred_element_type=jnp.float32) + b2
    return lax.dot_general(h2.astype(cd), w1c, (((1,), (0,)), ((), ())),
                           preferred_element_type=jnp.float32) + b3


if __name__ == "__main__":
    key = jax.random.PRNGKey(0)
    k_x, k_w1, k_b1, k_w2, k_b2, k_b3 = jax.random.split(key, 6)

    batch = 32           # small; with tile_b=16 this exercises a 2-step batch grid
    input_size = 16      # output_size must equal input_size (weight tying)
    hidden_size = 32

    x = jax.random.normal(k_x, (batch, input_size), dtype=jnp.float32)

    # Deterministic synthetic parameters (PyTorch-style [out, in] layout).
    w1 = jax.random.normal(k_w1, (hidden_size, input_size), dtype=jnp.float32) * 0.1
    b1 = jax.random.normal(k_b1, (hidden_size,), dtype=jnp.float32) * 0.1
    # "precomputed_weights" for fc2 (frozen in the original module).
    w2 = jax.random.normal(k_w2, (hidden_size, hidden_size), dtype=jnp.float32) * 0.1
    b2 = jax.random.normal(k_b2, (hidden_size,), dtype=jnp.float32) * 0.1
    b3 = jax.random.normal(k_b3, (input_size,), dtype=jnp.float32) * 0.1

    fwd = jax.jit(functools.partial(neural_network_forward, tile_b=16, use_bf16=True))
    out = jax.block_until_ready(fwd(x, w1, b1, w2, b2, b3))

    assert out.shape == (batch, input_size)

    # Tight check vs. a reference using identical bf16-operand / f32-accumulate math.
    ref_bf16 = reference_forward(x, w1, b1, w2, b2, b3, use_bf16=True)
    assert jnp.allclose(out, ref_bf16, atol=1e-3, rtol=1e-3), "mismatch vs bf16 reference"

    # Sanity check vs. the full-f32 PyTorch-semantics reference (bf16 rounding tolerance).
    ref_f32 = reference_forward(x, w1, b1, w2, b2, b3, use_bf16=False)
    assert jnp.allclose(out, ref_f32, atol=3e-2, rtol=3e-2), "mismatch vs f32 reference"

    print("KERNEL_OK")
</pallas_src>

<mosaic_0001>
module attributes {stable_mosaic.version = 11 : i64} {
  func.func @mlp_kernel(%arg0: i32, %arg1: memref<16x128xbf16, #tpu.memory_space<vmem>>, %arg2: memref<128x128xbf16, #tpu.memory_space<vmem>>, %arg3: memref<1x128xf32, #tpu.memory_space<vmem>>, %arg4: memref<128x128xbf16, #tpu.memory_space<vmem>>, %arg5: memref<1x128xf32, #tpu.memory_space<vmem>>, %arg6: memref<1x128xf32, #tpu.memory_space<vmem>>, %arg7: memref<16x128xf32, #tpu.memory_space<vmem>>) attributes {dimension_semantics = [#tpu.dimension_semantics<parallel>], iteration_bounds = array<i64: 2>, scalar_prefetch = 0 : i64, scratch_operands = 0 : i64, tpu.core_type = #tpu.core_type<tc>, window_params = [{transform_indices = @transform_0, window_bounds = array<i64: 16, 128>}, {pipeline_mode = #tpu.pipeline_mode<synchronous>, transform_indices = @transform_1, window_bounds = array<i64: 128, 128>}, {pipeline_mode = #tpu.pipeline_mode<synchronous>, transform_indices = @transform_2, window_bounds = array<i64: 1, 128>}, {pipeline_mode = #tpu.pipeline_mode<synchronous>, transform_indices = @transform_3, window_bounds = array<i64: 128, 128>}, {pipeline_mode = #tpu.pipeline_mode<synchronous>, transform_indices = @transform_4, window_bounds = array<i64: 1, 128>}, {pipeline_mode = #tpu.pipeline_mode<synchronous>, transform_indices = @transform_5, window_bounds = array<i64: 1, 128>}, {transform_indices = @transform_6, window_bounds = array<i64: 16, 128>}]} {
    %c0 = arith.constant 0 : index
    %c0_0 = arith.constant 0 : index
    %0 = vector.load %arg1[%c0, %c0_0] : memref<16x128xbf16, #tpu.memory_space<vmem>>, vector<16x128xbf16>
    %c0_1 = arith.constant 0 : index
    %c0_2 = arith.constant 0 : index
    %1 = vector.load %arg2[%c0_1, %c0_2] : memref<128x128xbf16, #tpu.memory_space<vmem>>, vector<128x128xbf16>
    %c0_3 = arith.constant 0 : index
    %c0_4 = arith.constant 0 : index
    %2 = vector.load %arg4[%c0_3, %c0_4] : memref<128x128xbf16, #tpu.memory_space<vmem>>, vector<128x128xbf16>
    %cst = arith.constant dense<0.000000e+00> : vector<16x128xf32>
    %3 = tpu.matmul %0, %1, %cst {dimension_numbers = #tpu.dot_dimension_numbers<[1], [1], [0], [0], [0, 0, 1, 0], [], []>} : vector<16x128xbf16>, vector<128x128xbf16>, vector<16x128xf32> -> vector<16x128xf32>
    %c0_5 = arith.constant 0 : index
    %c0_6 = arith.constant 0 : index
    %4 = vector.load %arg3[%c0_5, %c0_6] : memref<1x128xf32, #tpu.memory_space<vmem>>, vector<1x128xf32>
    %5 = vector.broadcast %4 : vector<1x128xf32> to vector<16x128xf32>
    %6 = arith.addf %3, %5 : vector<16x128xf32>
    %7 = arith.truncf %6 : vector<16x128xf32> to vector<16x128xbf16>
    %cst_7 = arith.constant dense<0.000000e+00> : vector<16x128xf32>
    %8 = tpu.matmul %7, %2, %cst_7 {dimension_numbers = #tpu.dot_dimension_numbers<[1], [1], [0], [0], [0, 0, 1, 0], [], []>} : vector<16x128xbf16>, vector<128x128xbf16>, vector<16x128xf32> -> vector<16x128xf32>
    %c0_8 = arith.constant 0 : index
    %c0_9 = arith.constant 0 : index
    %9 = vector.load %arg5[%c0_8, %c0_9] : memref<1x128xf32, #tpu.memory_space<vmem>>, vector<1x128xf32>
    %10 = vector.broadcast %9 : vector<1x128xf32> to vector<16x128xf32>
    %11 = arith.addf %8, %10 : vector<16x128xf32>
    %12 = arith.truncf %11 : vector<16x128xf32> to vector<16x128xbf16>
    %cst_10 = arith.constant dense<0.000000e+00> : vector<16x128xf32>
    %13 = tpu.matmul %12, %1, %cst_10 {dimension_numbers = #tpu.dot_dimension_numbers<[1], [0], [0], [1], [0, 0, 1, 1], [], []>} : vector<16x128xbf16>, vector<128x128xbf16>, vector<16x128xf32> -> vector<16x128xf32>
    %c0_11 = arith.constant 0 : index
    %c0_12 = arith.constant 0 : index
    %14 = vector.load %arg6[%c0_11, %c0_12] : memref<1x128xf32, #tpu.memory_space<vmem>>, vector<1x128xf32>
    %15 = vector.broadcast %14 : vector<1x128xf32> to vector<16x128xf32>
    %16 = arith.addf %13, %15 : vector<16x128xf32>
    %c0_13 = arith.constant 0 : index
    %c0_14 = arith.constant 0 : index
    %17 = vector.load %arg7[%c0_13, %c0_14] : memref<16x128xf32, #tpu.memory_space<vmem>>, vector<16x128xf32>
    tpu.vector_store %arg7[%c0_13, %c0_14], %16 {strides = array<i32>} : memref<16x128xf32, #tpu.memory_space<vmem>>, vector<16x128xf32>,
    return
  }
  func.func @transform_0(%arg0: i32) -> (i32, i32) {
    %c0_i32 = arith.constant 0 : i32
    %c0_i32_0 = arith.constant 0 : i32
    return %arg0, %c0_i32 : i32, i32
  }
  func.func @transform_1(%arg0: i32) -> (i32, i32) {
    %c0_i32 = arith.constant 0 : i32
    %c0_i32_0 = arith.constant 0 : i32
    %c0_i32_1 = arith.constant 0 : i32
    return %c0_i32, %c0_i32_0 : i32, i32
  }
  func.func @transform_2(%arg0: i32) -> (i32, i32) {
    %c0_i32 = arith.constant 0 : i32
    %c0_i32_0 = arith.constant 0 : i32
    %c0_i32_1 = arith.constant 0 : i32
    return %c0_i32, %c0_i32_0 : i32, i32
  }
  func.func @transform_3(%arg0: i32) -> (i32, i32) {
    %c0_i32 = arith.constant 0 : i32
    %c0_i32_0 = arith.constant 0 : i32
    %c0_i32_1 = arith.constant 0 : i32
    return %c0_i32, %c0_i32_0 : i32, i32
  }
  func.func @transform_4(%arg0: i32) -> (i32, i32) {
    %c0_i32 = arith.constant 0 : i32
    %c0_i32_0 = arith.constant 0 : i32
    %c0_i32_1 = arith.constant 0 : i32
    return %c0_i32, %c0_i32_0 : i32, i32
  }
  func.func @transform_5(%arg0: i32) -> (i32, i32) {
    %c0_i32 = arith.constant 0 : i32
    %c0_i32_0 = arith.constant 0 : i32
    %c0_i32_1 = arith.constant 0 : i32
    return %c0_i32, %c0_i32_0 : i32, i32
  }
  func.func @transform_6(%arg0: i32) -> (i32, i32) {
    %c0_i32 = arith.constant 0 : i32
    %c0_i32_0 = arith.constant 0 : i32
    return %arg0, %c0_i32 : i32, i32
  }
}

</mosaic_0001>

<bundles_post_ra>
// kernel: neural_network_forward.1
= control target key start
LH: loop header
LB: loop body
LE: loop exit
PB: predicated region body
PF: predicated region fallthrough
CT: control target
= control target key end

     0   :  { %s786_s21 = smov 0   ;;  %s897_s0 = inlined_call_operand.vmem [shape: bf16[32,128], index: 0, kind: input, shape index: {}]   ;;  %s898_s1 = inlined_call_operand.vmem [shape: bf16[128,128], index: 1, kind: input, shape index: {}]   ;;  %s899_s2 = inlined_call_operand.vmem [shape: f32[1,128], index: 2, kind: input, shape index: {}]   ;;  %s900_s3 = inlined_call_operand.vmem [shape: bf16[128,128], index: 3, kind: input, shape index: {}]   ;;  %s901_s4 = inlined_call_operand.vmem [shape: f32[1,128], index: 4, kind: input, shape index: {}]   ;;  %s902_s5 = inlined_call_operand.vmem [shape: f32[1,128], index: 5, kind: input, shape index: {}]   ;;  %s903_s6 = inlined_call_operand.vmem [shape: f32[32,128], index: 6, kind: output, shape index: {}]  }
   0x1 LB: > { %s596_s22 = sadd.s32 4294967295, %s747_s21   ;;  %p600_p0 = scmp.ge.s32.totalorder %s747_s21, 1  ;;  %s747_s21 = sphi %s786_s21, %s16_s21  }
   0x2   : > { %p213_p1 = scmp.lt.s32.totalorder %s747_s21, 3 }
   0x4   : > { %p214_p2 = pnand %p600_p0, %p213_p1 }
   0x5   : > { %v724_v0 = vld [vmem:[%s898_s1] sm:$0xff] (!%p214_p2)   ;;  %v749_v1 = vmov (!%p214_p2), 0.0   ;;  %vm750_vm0 = vmmov (!%p214_p2), 0   ;;  %s601_s25 = sshll.u32 (!%p214_p2), %s596_s22, 1  ;;  %v725_v2 = vld [vmem:[%s898_s1 + $0x8] sm:$0xff] (!%p214_p2)   ;;  %v726_v4 = vld [vmem:[%s898_s1 + $0x10] sm:$0xff] (!%p214_p2)  }
   0x6   : > { %217 = sbr.rel (%p214_p2) target bundleno = 723 (0x2d3), region = 44  ;;  %654 = vmatprep.subr.bf16.mxu0 (!%p214_p2), %v749_v1  ;;  %674 = vmatprep.subr.bf16.mxu1 (!%p214_p2), %v749_v1  ;;  %p244_p3 = scmp.lt.s32.totalorder (!%p214_p2), %s601_s25, 3  ;;  %v733_v3 = vld [vmem:[%s900_s3] sm:$0xff] (!%p214_p2)   ;;  %v734_v5 = vld [vmem:[%s900_s3 + $0x8] sm:$0xff] (!%p214_p2)   ;;  %v727_v6 = vld [vmem:[%s898_s1 + $0x18] sm:$0xff] (!%p214_p2)  }
   0x7   : > { %655 = vmatpush3.bf16.xpose.msra.mxu0 (!%p214_p2), %v724_v0  ;;  %670 = vmatprep.mubr.msk.bf16.mxu0 (!%p214_p2), %vm750_vm0, %v749_v1  ;;  %v735_v7 = vld [vmem:[%s900_s3 + $0x10] sm:$0xff] (!%p214_p2)   ;;  %v728_v8 = vld [vmem:[%s898_s1 + $0x20] sm:$0xff] (!%p214_p2)   ;;  %v736_v9 = vld [vmem:[%s900_s3 + $0x18] sm:$0xff] (!%p214_p2)  }
   0x8   : > { %656 = vmatprep.subr.bf16.mxu0 (!%p214_p2), %v749_v1  ;;  %690 = vmatprep.mubr.msk.bf16.mxu1 (!%p214_p2), %vm750_vm0, %v749_v1  ;;  %v729_v10 = vld [vmem:[%s898_s1 + $0x28] sm:$0xff] (!%p214_p2)   ;;  %v737_v11 = vld [vmem:[%s900_s3 + $0x20] sm:$0xff] (!%p214_p2)   ;;  %v730_v12 = vld [vmem:[%s898_s1 + $0x30] sm:$0xff] (!%p214_p2)  }
   0x9   : > { %675 = vmatpush3.bf16.xpose.msra.mxu1 (!%p214_p2), %v733_v3  ;;  %v738_v13 = vld [vmem:[%s900_s3 + $0x28] sm:$0xff] (!%p214_p2)   ;;  %v731_v14 = vld [vmem:[%s898_s1 + $0x38] sm:$0xff] (!%p214_p2)   ;;  %v739_v15 = vld [vmem:[%s900_s3 + $0x30] sm:$0xff] (!%p214_p2)  }
   0xa   : > { %676 = vmatprep.subr.bf16.mxu1 (!%p214_p2), %v749_v1  ;;  %v740_v17 = vld [vmem:[%s900_s3 + $0x38] sm:$0xff] (!%p214_p2)   ;;  %v605_v18 = vld [vmem:[%s899_s2] ss:$0 sm:$0xff] (!%p214_p2) }
   0xb   : > { %v615_v26 = vld [vmem:[%s901_s4] ss:$0 sm:$0xff] (!%p214_p2) }
   0xc   : > { %v624_v34 = vld [vmem:[%s902_s5] ss:$0 sm:$0xff] (!%p214_p2) }
   0xd   : > { %s905_s25 = smov (!%p244_p3, %s601_s25), 3 }
   0xe   : > { %s602_s28 = sshll.u32 %s905_s25, 2  ;;  %s604_s18 = sshll.u32 %s905_s25, 3 }
   0xf   : > { %s813_s7 = scalar_lea.vmem %s897_s0, %s602_s28  ;;  %657 = vmatpush3.bf16.xpose.msra.mxu0 %v725_v2  ;;  %s253_s24 = scalar_lea.vmem %s903_s6, %s604_s18 }
  0x10   : > { %658 = vmatprep.subr.bf16.mxu0 %v749_v1  ;;  %v732_v16 = vld [vmem:[%s813_s7] sm:$0xff]  }
  0x11   : > { %677 = vmatpush3.bf16.xpose.msra.mxu1 %v734_v5 }
  0x12   : > { %678 = vmatprep.subr.bf16.mxu1 %v749_v1 }
  0x17   : > { %659 = vmatpush3.bf16.xpose.msra.mxu0 %v726_v4 }
  0x18   : > { %660 = vmatprep.subr.bf16.mxu0 %v749_v1 }
  0x19   : > { %679 = vmatpush3.bf16.xpose.msra.mxu1 %v735_v7 }
  0x1a   : > { %680 = vmatprep.subr.bf16.mxu1 %v749_v1 }
  0x1f   : > { %661 = vmatpush3.bf16.xpose.msra.mxu0 %v727_v6 }
  0x20   : > { %662 = vmatprep.subr.bf16.mxu0 %v749_v1 }
  0x21   : > { %681 = vmatpush3.bf16.xpose.msra.mxu1 %v736_v9 }
  0x22   : > { %682 = vmatprep.subr.bf16.mxu1 %v749_v1 }
  0x27   : > { %663 = vmatpush3.bf16.xpose.msra.mxu0 %v728_v8 }
  0x28   : > { %664 = vmatprep.subr.bf16.mxu0 %v749_v1 }
  0x29   : > { %683 = vmatpush3.bf16.xpose.msra.mxu1 %v737_v11 }
  0x2a   : > { %684 = vmatprep.subr.bf16.mxu1 %v749_v1 }
  0x2f   : > { %665 = vmatpush3.bf16.xpose.msra.mxu0 %v729_v10 }
  0x30   : > { %666 = vmatprep.subr.bf16.mxu0 %v749_v1 }
  0x31   : > { %685 = vmatpush3.bf16.xpose.msra.mxu1 %v738_v13 }
  0x32   : > { %686 = vmatprep.subr.bf16.mxu1 %v749_v1 }
  0x37   : > { %667 = vmatpush3.bf16.xpose.msra.mxu0 %v730_v12 }
  0x38   : > { %668 = vmatprep.subr.bf16.mxu0 %v749_v1 }
  0x39   : > { %687 = vmatpush3.bf16.xpose.msra.mxu1 %v739_v15 }
  0x3a   : > { %688 = vmatprep.subr.bf16.mxu1 %v749_v1 }
  0x3f   : > { %669 = vmatpush3.bf16.xpose.msra.mxu0 %v731_v14 }
  0x40   : > { %694 = vmatprep.subr.bf16.mxu0 %v749_v1 }
  0x41   : > { %689 = vmatpush3.bf16.xpose.msra.mxu1 %v740_v17 }
  0x46   : > { %671 = vmatmul.mubr.bf16.vlgmr.msra.gmra.mrb[0].mxu0 %v732_v16 }
  0x47   : > { %695 = vmatpush3.bf16.msra.mxu0 %v724_v0  ;;  %710 = vmatprep.mubr.msk.bf16.mxu0 %vm750_vm0, %v749_v1 }
  0x48   : > { %696 = vmatprep.subr.bf16.mxu0 %v749_v1 }
  0x4b   : > { %697 = vmatpush3.bf16.msra.mxu0 %v725_v2 }
  0x4c   : > { %698 = vmatprep.subr.bf16.mxu0 %v749_v1 }
  0x4f   : > { %699 = vmatpush3.bf16.msra.mxu0 %v726_v4 }
  0x50   : > { %700 = vmatprep.subr.bf16.mxu0 %v749_v1 }
  0x53   : > { %701 = vmatpush3.bf16.msra.mxu0 %v727_v6 }
  0x54   : > { %702 = vmatprep.subr.bf16.mxu0 %v749_v1 }
  0x57   : > { %703 = vmatpush3.bf16.msra.mxu0 %v728_v8 }
  0x58   : > { %704 = vmatprep.subr.bf16.mxu0 %v749_v1 }
  0x5b   : > { %705 = vmatpush3.bf16.msra.mxu0 %v729_v10 }
  0x5c   : > { %706 = vmatprep.subr.bf16.mxu0 %v749_v1 }
  0x5f   : > { %707 = vmatpush3.bf16.msra.mxu0 %v730_v12 }
  0x60   : > { %708 = vmatprep.subr.bf16.mxu0 %v749_v1 }
  0x63   : > { %709 = vmatpush3.bf16.msra.mxu0 %v731_v14 }
 0x119   : > { %v385_v19 = vpop.f32.mrb[0].mxu0 }
 0x11a   : > { %v672_v20 = vpop.f32.mrb[1].mxu0  ;;  %v386_v22 = vadd.f32 %v605_v18, %v385_v19 }
 0x11b   : > { %v388_v21 = vpop.f32.mrb[2].mxu0 }
 0x11c   : > { %v389_v23 = vadd.f32 %v605_v18, %v388_v21  ;;  %v673_v24 = vpop.f32.mrb[3].mxu0 }
 0x11e   : > { %v392_v25 = vpack.c.bf16 %v389_v23, %v386_v22 }
 0x120   : > { %691 = vmatmul.mubr.bf16.vlgmr.msra.gmra.mrb[0].mxu1 %v392_v25 }
 0x1f3   : > { %v482_v27 = vpop.f32.mrb[0].mxu1 }
 0x1f4   : > { %v692_v28 = vpop.f32.mrb[1].mxu1  ;;  %v483_v30 = vadd.f32 %v615_v26, %v482_v27 }
 0x1f5   : > { %v485_v29 = vpop.f32.mrb[2].mxu1 }
 0x1f6   : > { %v486_v31 = vadd.f32 %v615_v26, %v485_v29  ;;  %v693_v32 = vpop.f32.mrb[3].mxu1 }
 0x1f8   : > { %v489_v33 = vpack.c.bf16 %v486_v31, %v483_v30 }
 0x1fa   : > { %711 = vmatmul.mubr.bf16.vlgmr.msra.gmra.mrb[4].mxu0 %v489_v33 }
 0x2cd   : > { %v531_v35 = vpop.f32.mrb[4].mxu0 }
 0x2ce   : > { %v532_v36 = vadd.f32 %v624_v34, %v531_v35  ;;  %v712_v37 = vpop.f32.mrb[5].mxu0 }
 0x2cf   : > { %v534_v38 = vpop.f32.mrb[6].mxu0 }
 0x2d0   : > { %538 = vst [vmem:[%s253_s24] sm:$0xff] %v532_v36  ;;  %v535_v39 = vadd.f32 %v624_v34, %v534_v38  ;;  %v713_v40 = vpop.f32.mrb[7].mxu0 }
 0x2d2   : > { %539 = vst [vmem:[%s253_s24 + $0x8] sm:$0xff] %v535_v39 }
 0x2d3 PF: > { %s16_s21 = sadd.s32 1, %s747_s21  }
 0x2d4   : > { %p13_p4 = scmp.ge.s32.totalorder %s16_s21, 4  }
 0x2d6   :  { %15 = sbr.rel (!%p13_p4) target bundleno = 1 (0x1), region = 74 }

</bundles_post_ra>
